<compile_context>
chip_gen: v5e
topology: v5e:2x2
jax: 0.10.0
libtpu: 0.0.40
codegen_flags: <defaults>
</compile_context>

<pallas_src>
import functools

import jax
import jax.numpy as jnp
from jax.experimental import pallas as pl
from jax.experimental.pallas import tpu as pltpu


# ----------------------------- Pallas kernel ------------------------------ #

def linear_br_kernel(x_ref, w_ref, b_ref, o_ref, *,
                     mac_threshold, acc_dtype, strided_x_bcast):
    # x_ref: (1, Cin, TN)   w_ref: (Cout, Cin)   b_ref: (Cout, 1)   o_ref: (1, Cout, TN)
    cout, cin = w_ref.shape
    tn = x_ref.shape[-1]
    b = b_ref[...].astype(acc_dtype)                       # (Cout, 1) folded-BN bias

    if cin <= mac_threshold:
        # Tiny contraction: unrolled VPU broadcast-MAC (a K=Cin MXU pass would
        # waste >95% of the array and force padded operands).
        w = w_ref[...].astype(acc_dtype)                   # (Cout, Cin), a few vregs
        # Bias is the accumulator init: saves one full (Cout, TN) add pass.
        acc = jnp.broadcast_to(b, (cout, tn))
        if not strided_x_bcast:
            x = x_ref[0]                                   # (Cin, TN), loaded once
        for c in range(cin):                               # static unroll (Cin tiny)
            if strided_x_bcast:
                # stride-0 sublane read: row c replicated over Cout sublanes by the
                # load itself (broadcast rides the vld slot, not the VPU/XLU).
                x_bc = x_ref[0, pl.ds(c, cout, stride=0), :].astype(acc_dtype)
            else:
                x_bc = x[c:c + 1, :].astype(acc_dtype)     # (1, TN) sublane broadcast
            acc = acc + w[:, c:c + 1] * x_bc
    else:
        acc = (jnp.dot(w_ref[...], x_ref[0],
                       preferred_element_type=jnp.float32).astype(acc_dtype) + b)

    # LeakyReLU(0.1): max(h, 0.1*h) == where(h >= 0, h, 0.1*h) for slope in (0,1);
    # both forms propagate NaN.  Single max instead of compare+select.
    h = jnp.maximum(acc, acc * 0.1)
    o_ref[0] = h.astype(o_ref.dtype)


# ------------------------------- tiling ------------------------------------ #

def _pick_tile_n(n_pad, bsz, cin, cout, in_itemsize, out_itemsize, acc_itemsize,
                 vmem_budget_bytes, min_grid_steps):
    """Largest 128-multiple tile over N (up to full N) that divides n_pad, fits the
    VMEM budget (x/out double buffers + w/b buffers + accumulator temp + slack),
    and keeps at least `min_grid_steps` grid steps so both v7x TensorCores get
    work.  Falls back to the largest fitting tile if the step floor is unreachable."""
    cands = sorted({c for c in (n_pad, 32768, 16384, 8192, 4096, 2048, 1024, 512, 256, 128)
                    if 128 <= c <= n_pad and c % 128 == 0 and n_pad % c == 0},
                   reverse=True)

    def live_bytes(tn):
        return (2 * cin * tn * in_itemsize            # x tile, double-buffered
                + 2 * cout * tn * out_itemsize        # out tile, double-buffered
                + 2 * cout * cin * 4 + 2 * cout * 4   # w / b (constant index, 2 bufs)
                + cout * tn * acc_itemsize            # in-kernel accumulator temp
                + (1 << 20))                          # slack for Mosaic internals

    fitting = [tn for tn in cands if live_bytes(tn) <= vmem_budget_bytes] or [128]
    for tn in fitting:                                # largest first
        if bsz * (n_pad // tn) >= min_grid_steps:
            return tn
    return fitting[0]                                 # floor unreachable: take largest


# ------------------------------- wrapper ----------------------------------- #

def linear_br(x, w_folded, b_folded, *, out_dtype=None, tile_n=None,
              vmem_budget_bytes=32 * 1024 * 1024, min_grid_steps=4,
              mac_threshold=8, acc_dtype=jnp.float32,
              strided_x_bcast=False, x_buffers=2):
    """x: (B, Cin, N), w_folded: (Cout, Cin), b_folded: (Cout, 1) -> (B, Cout, N).

    out_dtype defaults to x.dtype (bf16 in -> bf16 out: halves the dominant output
    HBM stream).  acc_dtype=jnp.bfloat16 is a v6e/v7x-only lever (bf16 VPU); keep
    f32 on v5e.  mac_threshold (VPU-MAC vs MXU crossover) should be tuned per
    generation.  strided_x_bcast / x_buffers>2 are optional bundle-verified levers."""
    bsz, cin, n = x.shape
    cout = w_folded.shape[0]
    out_dtype = x.dtype if out_dtype is None else jnp.dtype(out_dtype)

    # Pad N to a multiple of 128 so every output tile is lane-dense (unmasked vst);
    # padded columns are sliced off after the call.
    n_pad = ((n + 127) // 128) * 128
    if n_pad != n:
        x = jnp.pad(x, ((0, 0), (0, 0), (0, n_pad - n)))

    if tile_n is None:
        tn = _pick_tile_n(n_pad, bsz, cin, cout,
                          x.dtype.itemsize, jnp.dtype(out_dtype).itemsize,
                          jnp.dtype(acc_dtype).itemsize,
                          vmem_budget_bytes, min_grid_steps)
    else:
        tn = tile_n
    assert n_pad % tn == 0 and tn % 128 == 0, "tile_n must be a 128-multiple dividing padded N"

    kernel = functools.partial(linear_br_kernel, mac_threshold=mac_threshold,
                               acc_dtype=acc_dtype, strided_x_bcast=strided_x_bcast)

    x_index_map = lambda i, j: (i, 0, j)
    if x_buffers > 2:
        # deepen x pipelining if a profile shows exposed input DMA at large tiles
        x_spec = pl.BlockSpec((1, cin, tn), x_index_map,
                              pipeline_mode=pl.Buffered(x_buffers))
    else:
        x_spec = pl.BlockSpec((1, cin, tn), x_index_map)

    out = pl.pallas_call(
        kernel,
        out_shape=jax.ShapeDtypeStruct((bsz, cout, n_pad), out_dtype),
        grid_spec=pltpu.PrefetchScalarGridSpec(
            num_scalar_prefetch=0,
            grid=(bsz, n_pad // tn),
            in_specs=[
                x_spec,
                pl.BlockSpec((cout, cin), lambda i, j: (0, 0)),   # fetched once
                pl.BlockSpec((cout, 1), lambda i, j: (0, 0)),     # fetched once
            ],
            out_specs=pl.BlockSpec((1, cout, tn), lambda i, j: (i, 0, j)),
        ),
        compiler_params=pltpu.CompilerParams(
            # both axes independent -> shard across v7x's 2 TensorCores
            dimension_semantics=("parallel", "parallel"),
            vmem_limit_bytes=int(vmem_budget_bytes)),
    )(x, w_folded, b_folded)

    if n_pad != n:
        out = out[:, :, :n]
    return out


def linear_br_forward(x, params, in_channels, **kwargs):
    """Replicates LinearBR.forward: layers only apply when x.shape[-2]==in_channels;
    otherwise the module discards the result and returns x unchanged."""
    if x.shape[-2] != in_channels:
        return x
    w_f, b_f = params
    return linear_br(x, w_f, b_f, **kwargs)


# ------------------------- params (Linear + folded BN) --------------------- #

def init_params(in_channels, out_channels, key, bias=True):
    """Deterministic nn.Linear(Cin, Cout, bias) + inference-mode BatchNorm1d(Cout),
    folded into a single (Cout, Cin) weight and (Cout, 1) bias."""
    k1, k2, k3 = jax.random.split(key, 3)
    bound = 1.0 / jnp.sqrt(jnp.float32(in_channels))
    w = jax.random.uniform(k1, (out_channels, in_channels), jnp.float32, -bound, bound)
    lin_b = (jax.random.uniform(k2, (out_channels,), jnp.float32, -bound, bound)
             if bias else jnp.zeros((out_channels,), jnp.float32))

    gamma = 1.0 + 0.1 * jax.random.normal(jax.random.fold_in(k3, 0), (out_channels,), jnp.float32)
    beta = 0.1 * jax.random.normal(jax.random.fold_in(k3, 1), (out_channels,), jnp.float32)
    mean = 0.05 * jax.random.normal(jax.random.fold_in(k3, 2), (out_channels,), jnp.float32)
    var = jnp.abs(1.0 + 0.1 * jax.random.normal(jax.random.fold_in(k3, 3), (out_channels,), jnp.float32))

    eps = 1e-5
    scale = gamma / jnp.sqrt(var + eps)
    w_f = w * scale[:, None]                              # (Cout, Cin)
    b_f = ((lin_b - mean) * scale + beta)[:, None]        # (Cout, 1)
    return w_f, b_f


def linear_br_reference(x, w_f, b_f):
    # pure-JAX reference for the Pallas-covered path
    h = jnp.einsum('oc,bcn->bon', w_f, x,
                   precision=jax.lax.Precision.HIGHEST) + b_f[None, :, :]
    return jnp.where(h >= 0, h, 0.1 * h)


# --------------------------------- main ------------------------------------ #

if __name__ == "__main__":
    key = jax.random.PRNGKey(0)
    B, Cin, Cout, N = 2, 4, 32, 256
    kx, kp = jax.random.split(key)
    x = jax.random.normal(kx, (B, Cin, N), jnp.float32)
    w_f, b_f = init_params(Cin, Cout, kp)

    # f32 run; the picker chooses the largest lane-dense tile that keeps >= 4 grid
    # steps (both v7x TensorCores busy) and fits the explicit VMEM budget.
    out = linear_br_forward(x, (w_f, b_f), Cin)
    out = jax.block_until_ready(out)
    assert out.shape == (B, Cout, N) and out.dtype == jnp.float32

    ref = linear_br_reference(x, w_f, b_f)
    assert jnp.allclose(out, ref, atol=1e-4, rtol=1e-4), "f32 mismatch vs reference"

    # bf16 inputs/weights, bf16 output (default out_dtype=x.dtype) and bf16
    # accumulation: v6e/v7x lever that halves the dominant output HBM stream and
    # the VPU vreg passes.  (Keep f32 acc on v5e.)
    out_bf16 = linear_br(x.astype(jnp.bfloat16), w_f.astype(jnp.bfloat16), b_f,
                         acc_dtype=jnp.bfloat16)
    out_bf16 = jax.block_until_ready(out_bf16)
    assert out_bf16.dtype == jnp.bfloat16
    assert jnp.allclose(out_bf16.astype(jnp.float32), ref, atol=5e-2, rtol=5e-2), \
        "bf16 mismatch vs reference"

    # ragged N (not a 128-multiple): wrapper pads, kernel tiles stay lane-dense,
    # padding is sliced off.
    x_odd = jax.random.normal(jax.random.fold_in(kx, 1), (B, Cin, 200), jnp.float32)
    out_odd = jax.block_until_ready(linear_br(x_odd, w_f, b_f))
    assert out_odd.shape == (B, Cout, 200)
    assert jnp.allclose(out_odd, linear_br_reference(x_odd, w_f, b_f),
                        atol=1e-4, rtol=1e-4), "padded-N mismatch vs reference"

    # mismatched-channel branch: module discards the layer output, returns x unchanged
    x_bad = jnp.ones((B, Cin + 1, N), jnp.float32)
    y = linear_br_forward(x_bad, (w_f, b_f), Cin)
    assert y.shape == (B, Cin + 1, N)

    print("KERNEL_OK")
</pallas_src>

<mosaic_0001>
module attributes {stable_mosaic.version = 11 : i64} {
  func.func @linear_br_kernel(%arg0: i32, %arg1: i32, %arg2: memref<1x4x128xf32, #tpu.memory_space<vmem>>, %arg3: memref<32x4xf32, #tpu.memory_space<vmem>>, %arg4: memref<32x1xf32, #tpu.memory_space<vmem>>, %arg5: memref<1x32x128xf32, #tpu.memory_space<vmem>>) attributes {dimension_semantics = [#tpu.dimension_semantics<parallel>, #tpu.dimension_semantics<parallel>], iteration_bounds = array<i64: 2, 2>, scalar_prefetch = 0 : i64, scratch_operands = 0 : i64, tpu.core_type = #tpu.core_type<tc>, window_params = [{transform_indices = @transform_0, window_bounds = array<i64: 1, 4, 128>}, {pipeline_mode = #tpu.pipeline_mode<synchronous>, transform_indices = @transform_1, window_bounds = array<i64: 32, 4>}, {pipeline_mode = #tpu.pipeline_mode<synchronous>, transform_indices = @transform_2, window_bounds = array<i64: 32, 1>}, {transform_indices = @transform_3, window_bounds = array<i64: 1, 32, 128>}]} {
    %c0 = arith.constant 0 : index
    %c0_0 = arith.constant 0 : index
    %0 = vector.load %arg4[%c0, %c0_0] : memref<32x1xf32, #tpu.memory_space<vmem>>, vector<32x1xf32>
    %c0_1 = arith.constant 0 : index
    %c0_2 = arith.constant 0 : index
    %1 = vector.load %arg3[%c0_1, %c0_2] : memref<32x4xf32, #tpu.memory_space<vmem>>, vector<32x4xf32>
    %2 = vector.shape_cast %0 : vector<32x1xf32> to vector<32x1xf32>
    %3 = vector.broadcast %2 : vector<32x1xf32> to vector<32x128xf32>
    %c0_3 = arith.constant 0 : index
    %c0_4 = arith.constant 0 : index
    %c0_5 = arith.constant 0 : index
    %4 = vector.load %arg2[%c0_3, %c0_4, %c0_5] : memref<1x4x128xf32, #tpu.memory_space<vmem>>, vector<1x4x128xf32>
    %5 = vector.shape_cast %4 : vector<1x4x128xf32> to vector<4x128xf32>
    %6 = vector.extract_strided_slice %5 {offsets = [0, 0], sizes = [1, 128], strides = [1, 1]} : vector<4x128xf32> to vector<1x128xf32>
    %7 = vector.extract_strided_slice %1 {offsets = [0, 0], sizes = [32, 1], strides = [1, 1]} : vector<32x4xf32> to vector<32x1xf32>
    %8 = vector.broadcast %7 : vector<32x1xf32> to vector<32x128xf32>
    %9 = vector.broadcast %6 : vector<1x128xf32> to vector<32x128xf32>
    %10 = arith.mulf %8, %9 : vector<32x128xf32>
    %11 = arith.addf %3, %10 : vector<32x128xf32>
    %12 = vector.extract_strided_slice %5 {offsets = [1, 0], sizes = [1, 128], strides = [1, 1]} : vector<4x128xf32> to vector<1x128xf32>
    %13 = vector.extract_strided_slice %1 {offsets = [0, 1], sizes = [32, 1], strides = [1, 1]} : vector<32x4xf32> to vector<32x1xf32>
    %14 = vector.broadcast %13 : vector<32x1xf32> to vector<32x128xf32>
    %15 = vector.broadcast %12 : vector<1x128xf32> to vector<32x128xf32>
    %16 = arith.mulf %14, %15 : vector<32x128xf32>
    %17 = arith.addf %11, %16 : vector<32x128xf32>
    %18 = vector.extract_strided_slice %5 {offsets = [2, 0], sizes = [1, 128], strides = [1, 1]} : vector<4x128xf32> to vector<1x128xf32>
    %19 = vector.extract_strided_slice %1 {offsets = [0, 2], sizes = [32, 1], strides = [1, 1]} : vector<32x4xf32> to vector<32x1xf32>
    %20 = vector.broadcast %19 : vector<32x1xf32> to vector<32x128xf32>
    %21 = vector.broadcast %18 : vector<1x128xf32> to vector<32x128xf32>
    %22 = arith.mulf %20, %21 : vector<32x128xf32>
    %23 = arith.addf %17, %22 : vector<32x128xf32>
    %24 = vector.extract_strided_slice %5 {offsets = [3, 0], sizes = [1, 128], strides = [1, 1]} : vector<4x128xf32> to vector<1x128xf32>
    %25 = vector.extract_strided_slice %1 {offsets = [0, 3], sizes = [32, 1], strides = [1, 1]} : vector<32x4xf32> to vector<32x1xf32>
    %26 = vector.broadcast %25 : vector<32x1xf32> to vector<32x128xf32>
    %27 = vector.broadcast %24 : vector<1x128xf32> to vector<32x128xf32>
    %28 = arith.mulf %26, %27 : vector<32x128xf32>
    %29 = arith.addf %23, %28 : vector<32x128xf32>
    %cst = arith.constant 1.000000e-01 : f32
    %30 = vector.broadcast %cst : f32 to vector<32x128xf32>
    %31 = arith.mulf %29, %30 : vector<32x128xf32>
    %32 = arith.maximumf %29, %31 : vector<32x128xf32>
    %c0_6 = arith.constant 0 : index
    %c0_7 = arith.constant 0 : index
    %c0_8 = arith.constant 0 : index
    %33 = vector.load %arg5[%c0_6, %c0_7, %c0_8] : memref<1x32x128xf32, #tpu.memory_space<vmem>>, vector<1x32x128xf32>
    %34 = vector.shape_cast %33 : vector<1x32x128xf32> to vector<32x128xf32>
    %35 = vector.shape_cast %32 : vector<32x128xf32> to vector<1x32x128xf32>
    tpu.vector_store %arg5[%c0_6, %c0_7, %c0_8], %35 {strides = array<i32>} : memref<1x32x128xf32, #tpu.memory_space<vmem>>, vector<1x32x128xf32>,
    return
  }
  func.func @transform_0(%arg0: i32, %arg1: i32) -> (i32, i32, i32) {
    %c0_i32 = arith.constant 0 : i32
    %c0_i32_0 = arith.constant 0 : i32
    return %arg0, %c0_i32, %arg1 : i32, i32, i32
  }
  func.func @transform_1(%arg0: i32, %arg1: i32) -> (i32, i32) {
    %c0_i32 = arith.constant 0 : i32
    %c0_i32_0 = arith.constant 0 : i32
    %c0_i32_1 = arith.constant 0 : i32
    return %c0_i32, %c0_i32_0 : i32, i32
  }
  func.func @transform_2(%arg0: i32, %arg1: i32) -> (i32, i32) {
    %c0_i32 = arith.constant 0 : i32
    %c0_i32_0 = arith.constant 0 : i32
    %c0_i32_1 = arith.constant 0 : i32
    return %c0_i32, %c0_i32_0 : i32, i32
  }
  func.func @transform_3(%arg0: i32, %arg1: i32) -> (i32, i32, i32) {
    %c0_i32 = arith.constant 0 : i32
    %c0_i32_0 = arith.constant 0 : i32
    return %arg0, %c0_i32, %arg1 : i32, i32, i32
  }
}

</mosaic_0001>

<bundles_post_ra>
// kernel: tpu_custom_call.1
= control target key start
LH: loop header
LB: loop body
LE: loop exit
PB: predicated region body
PF: predicated region fallthrough
CT: control target
= control target key end

     0   :  { %8 = vsyncpa [#allocation3], 0  ;;  %s813_s0 = inlined_call_operand.vmem [shape: f32[2,4,256], index: 0, kind: input, shape index: {}]   ;;  %s814_s1 = inlined_call_operand.vmem [shape: f32[32,4], index: 1, kind: input, shape index: {}]   ;;  %s815_s2 = inlined_call_operand.vmem [shape: f32[32,1], index: 2, kind: input, shape index: {}]   ;;  %s816_s3 = inlined_call_operand.hbm [shape: f32[2,32,256], index: 3, kind: output, shape index: {}]  }
   0x1   :  { %10 = vsyncpa [#allocation3 + $0x1], 0  ;;  %s663_s12 = smov 0   ;;  %s665_s13 = smov 0  }
   0x2   :  { %s667_s14 = smov 0   ;;  %s669_s15 = smov 0  }
   0x3   :  { %s671_s16 = smov 0   ;;  %s673_s17 = smov 0  }
   0x4   :  { %s675_s18 = smov 0   ;;  %s677_s19 = smov 0  }
   0x5 LB: > { %s437_s20 = sadd.s32 4294967295, %s634_s19   ;;  %s438_s21 = sadd.s32 4294967294, %s634_s19   ;;  %s634_s19 = sphi %s677_s19, %s16_s19   ;;  %s630_s18 = sphi %s675_s18, %s825_s18   ;;  %s626_s17 = sphi %s673_s17, %s824_s17   ;;  %s622_s16 = sphi %s671_s16, %s823_s16   ;;  %s618_s15 = sphi %s669_s15, %s822_s15   ;;  %s614_s14 = sphi %s667_s14, %s821_s14   ;;  %s610_s13 = sphi %s665_s13, %s820_s13   ;;  %s606_s12 = sphi %s663_s12, %s819_s12  }
   0x6   : > { %s25_s22 = sadd.s32 1, %s626_s17  ;;  %s28_s23 = sadd.s32 1, %s630_s18 }
   0x7   : > { %p26_p0 = scmp.ge.s32.totalorder %s25_s22, 2  ;;  %p117_p1 = scmp.ne.s32.totalorder %s614_s14, %s610_s13 }
   0x8   : > { %p118_p2 = scmp.eq.s32.totalorder %s437_s20, 3  ;;  %p123_p5 = scmp.ne.s32.totalorder %s610_s13, %s606_s12 }
   0x9   : > { %s827_s22 = smov (%p26_p0, %s25_s22), 0  ;;  %s829_s23 = smov (!%p26_p0, %s28_s23), %s630_s18 }
   0xa   : > { %s103_s24 = ssub.s32 %s626_s17, %s827_s22  ;;  %p714_p3 = por %p118_p2, %p117_p1 }
   0xb   : > { %p30_p4 = scmp.ge.s32.totalorder %s829_s23, 2  ;;  %p124_p6 = scmp.eq.s32.totalorder %s438_s21, 3 }
   0xc   : > { %p441_p7 = scmp.ge.s32.totalorder %s634_s19, 1  ;;  %p159_p9 = scmp.lt.s32.totalorder %s634_s19, 5 }
   0xd   : > { %s831_s23 = smov (%p30_p4, %s829_s23), 0  ;;  %p723_p8 = por %p124_p6, %p123_p5 }
   0xe   : > { %s102_s27 = ssub.s32 %s630_s18, %s831_s23  ;;  %s107_s28 = sadd.s32 1, %s614_s14 }
   0xf   : > { %s104_s29 = sor.u32 %s103_s24, %s102_s27  ;;  %p160_p10 = pnand %p441_p7, %p159_p9 }
  0x10   : > { %p105_p11 = scmp.eq.s32.totalorder %s104_s29, 0  ;;  %p186_p12 = scmp.lt.s32.totalorder (!%p160_p10), %s622_s16, 1 }
  0x11   : > { %163 = sbr.rel (%p160_p10) target bundleno = 203 (0xcb), region = 32  ;;  %p188_p13 = scmp.lt.s32.totalorder (!%p160_p10), %s618_s15, 1 }
  0x12   : > { %s732_s30 = scalar_select %p105_p11, %s614_s14, %s107_s28  }
  0x13   : > { %s183_s24 = sand.u32 (!%p160_p10), 1, %s610_s13   ;;  %s446_s28 = sshll.u32 (!%p160_p10), %s622_s16, 3 }
  0x14   : > { %s442_s27 = sshll.u32 (!%p160_p10), %s183_s24, 5  ;;  %s350_s4 = sadd.s32 (!%p160_p10), %s618_s15, %s446_s28 }
  0x15   : > { %s185_s29 = scalar_lea.vmem (!%p160_p10), [#allocation2], %s442_s27  ;;  %s447_s5 = sshll.u32 (!%p160_p10), %s350_s4, 3 }
  0x16   : > { %v196_v0 = vld [vmem:[%s815_s2 + $0x10] sm:$0xff]  ;;  %v194_v1 = vld [vmem:[%s815_s2] sm:$0xff]  ;;  %v636_v2 = vmov 0   ;;  %v197_v4 = vld [vmem:[%s815_s2 + $0x18] sm:$0xff]  ;;  %v637_v9 = vmov 1   ;;  %v638_v10 = vmov 2  }
  0x17   : > { %529 = vset.pattern.permute.xlu1 %v636_v2  ;;  %528 = vset.pattern.permute.xlu0 %v636_v2  ;;  %v198_v3 = vld [vmem:[%s814_s1] sm:$0xff]  ;;  %v195_v5 = vld [vmem:[%s815_s2 + $0x8] sm:$0xff]  ;;  %v201_v7 = vld [vmem:[%s814_s1 + $0x18] sm:$0xff]  ;;  %v639_v11 = vmov 3   ;;  %s187_s6 = scalar_select %p186_p12, %s622_s16, 1 }
  0x18   : > { %214 = vperm.xlu1 %529, %v196_v0   ;;  %204 = vperm.xlu0 %528, %v194_v1   ;;  %v199_v6 = vld [vmem:[%s814_s1 + $0x8] sm:$0xff]  ;;  %v200_v8 = vld [vmem:[%s814_s1 + $0x10] sm:$0xff]  ;;  %s189_s7 = scalar_select %p188_p13, %s618_s15, 1 }
  0x19   : > { %530 = vset.pattern.permute.xlu2 %v636_v2  ;;  %s443_s8 = sshll.u32 %s187_s6, 1  ;;  %s560_s27 = scalar_lea.hbm %s816_s3, 128 }
  0x1a   : > { %225 = vperm.xlu2 %530, %v198_v3   ;;  %s191_s9 = sadd.s32 %s443_s8, %s189_s7  ;;  %s352_s7 = scalar_lea.hbm %s816_s3, %s447_s5 }
  0x1b   : > { %s444_s10 = sshll.u32 %s191_s9, 2  ;;  %s353_s8 = sshll.u32 %s185_s29, 4  ;;  %s354_s8 = int_to_ptr.vmem [resolvable:$true] %s353_s8 }
  0x1c   : > { %s193_s21 = scalar_lea.vmem %s813_s0, %s444_s10  ;;  %s355_s15 = sshll.u32 %s352_s7, 4  ;;  %s356_s15 = int_to_ptr.hbm [resolvable:$true] %s355_s15 }
  0x1d   : > { %v222_v23 = vld [vmem:[%s193_s21] sm:$0xf]  ;;  %s340_s9 = scalar_lea.sflag [#allocation3], %s183_s24  ;;  %s554_s10 = sshra.s32 %s356_s15, 4  ;;  %s555_s10 = int_to_ptr.hbm [resolvable:$true] %s554_s10 }
  0x1e   : > { %v243_v24 = vperm.slane %v222_v23, 0  ;;  %v268_v29 = vperm.slane %v222_v23, 1  ;;  %v318_v33 = vperm.slane %v222_v23, 3  ;;  %v293_v37 = vperm.slane %v222_v23, 2  ;;  %s556_s11 = scalar_lea.hbm %s555_s10, 32  ;;  %p561_p4 = scmp.lt.s32.totalorder %s555_s10, %s816_s3 }
  0x1f   : > { %p557_p0 = scmp.ne.s32.totalorder %s555_s10, %s556_s11  ;;  %p562_p5 = scmp.lt.s32.totalorder %s560_s27, %s556_s11 }
  0x20   : > { %219 = vperm.xlu1 %529, %v197_v4   ;;  %209 = vperm.xlu0 %528, %v195_v5  }
  0x21   : > { %p558_p1 = pnand %p557_p0, %p714_p3  ;;  %p563_p6 = por %p562_p5, %p561_p4 }
  0x22   : > { %230 = vperm.xlu2 %530, %v199_v6  }
  0x23   : > { %p559_p2 = pneg %p558_p1 }
  0x25   : > { %p564_p7 = pnand %p563_p6, %p559_p2 }
  0x28   : > { %240 = vperm.xlu1 %529, %v201_v7   ;;  %235 = vperm.xlu0 %528, %v200_v8  }
  0x2a   : > { %531 = vset.pattern.permute.xlu2 %v637_v9 }
  0x2b   : > { %253 = vperm.xlu2 %531, %v198_v3  }
  0x30   : > { %533 = vset.pattern.permute.xlu1 %v637_v9  ;;  %532 = vset.pattern.permute.xlu0 %v637_v9 }
  0x31   : > { %261 = vperm.xlu1 %533, %v200_v8   ;;  %257 = vperm.xlu0 %532, %v199_v6  }
  0x33   : > { %265 = vperm.xlu2 %531, %v201_v7  }
  0x39   : > { %534 = vset.pattern.permute.xlu1 %v638_v10  ;;  %536 = vset.pattern.permute.xlu0 %v638_v10 }
  0x3a   : > { %278 = vperm.xlu1 %534, %v198_v3   ;;  %286 = vperm.xlu0 %536, %v200_v8  }
  0x3b   : > { %535 = vset.pattern.permute.xlu2 %v638_v10 }
  0x3c   : > { %282 = vperm.xlu2 %535, %v199_v6  }
  0x42   : > { %290 = vperm.xlu1 %534, %v201_v7   ;;  %539 = vset.pattern.permute.xlu0 %v639_v11 }
  0x43   : > { %315 = vperm.xlu0 %539, %v201_v7  }
  0x44   : > { %537 = vset.pattern.permute.xlu2 %v639_v11 }
  0x45   : > { %303 = vperm.xlu2 %537, %v198_v3  }
  0x4a   : > { %538 = vset.pattern.permute.xlu1 %v639_v11 }
  0x4b   : > { %307 = vperm.xlu1 %538, %v199_v6  }
  0x4d   : > { %311 = vperm.xlu2 %537, %v200_v8  }
  0x74   : > { %v226_v12 = vpop.permute.xlu2 %225 }
  0x75   : > { %v244_v28 = vmul.f32 %v243_v24, %v226_v12 }
  0x7c   : > { %v231_v13 = vpop.permute.xlu2 %230 }
  0x7d   : > { %v245_v61 = vmul.f32 %v243_v24, %v231_v13 }
  0x85   : > { %v254_v14 = vpop.permute.xlu2 %253 }
  0x86   : > { %v269_v32 = vmul.f32 %v268_v29, %v254_v14 }
  0x8a   : > { %v215_v15 = vpop.permute.xlu1 %214  ;;  %v205_v16 = vpop.permute.xlu0 %204 }
  0x8b   : > { %v248_v31 = vadd.f32 %v244_v28, %v205_v16 }
  0x8d   : > { %v266_v17 = vpop.permute.xlu2 %265  ;;  %v273_v38 = vadd.f32 %v269_v32, %v248_v31 }
  0x8e   : > { %v272_v49 = vmul.f32 %v268_v29, %v266_v17 }
  0x92   : > { %v220_v18 = vpop.permute.xlu1 %219  ;;  %v210_v19 = vpop.permute.xlu0 %209 }
  0x93   : > { %v249_v1 = vadd.f32 %v245_v61, %v210_v19 }
  0x96   : > { %v283_v20 = vpop.permute.xlu2 %282 }
  0x97   : > { %v295_v3 = vmul.f32 %v293_v37, %v283_v20 }
  0x9a   : > { %v241_v21 = vpop.permute.xlu1 %240  ;;  %v236_v22 = vpop.permute.xlu0 %235 }
  0x9b   : > { %v246_v30 = vmul.f32 %v243_v24, %v236_v22  ;;  %v247_v39 = vmul.f32 %v243_v24, %v241_v21 }
  0x9d   : > { %v250_v36 = vadd.f32 %v246_v30, %v215_v15  ;;  %v251_v50 = vadd.f32 %v247_v39, %v220_v18 }
  0x9f   : > { %v304_v25 = vpop.permute.xlu2 %303  ;;  %v276_v58 = vadd.f32 %v272_v49, %v251_v50 }
  0xa0   : > { %v319_v40 = vmul.f32 %v318_v33, %v304_v25 }
  0xa3   : > { %v262_v26 = vpop.permute.xlu1 %261  ;;  %v258_v27 = vpop.permute.xlu0 %257 }
  0xa4   : > { %v271_v34 = vmul.f32 %v268_v29, %v262_v26  ;;  %v270_v62 = vmul.f32 %v268_v29, %v258_v27 }
  0xa6   : > { %v275_v43 = vadd.f32 %v271_v34, %v250_v36  ;;  %v274_v4 = vadd.f32 %v270_v62, %v249_v1 }
  0xa7   : > { %v312_v35 = vpop.permute.xlu2 %311 }
  0xa8   : > { %v321_v46 = vmul.f32 %v318_v33, %v312_v35  ;;  %v299_v8 = vadd.f32 %v295_v3, %v274_v4 }
  0xac   : > { %v279_v41 = vpop.permute.xlu1 %278  ;;  %v287_v42 = vpop.permute.xlu0 %286 }
  0xad   : > { %v294_v44 = vmul.f32 %v293_v37, %v279_v41  ;;  %v296_v45 = vmul.f32 %v293_v37, %v287_v42 }
  0xaf   : > { %v298_v47 = vadd.f32 %v294_v44, %v273_v38  ;;  %v300_v48 = vadd.f32 %v296_v45, %v275_v43 }
  0xb1   : > { %v323_v51 = vadd.f32 %v319_v40, %v298_v47  ;;  %v325_v52 = vadd.f32 %v321_v46, %v300_v48 }
  0xb3   : > { %v327_v53 = vmul.f32 0.1, %v323_v51  ;;  %v329_v54 = vmul.f32 0.1, %v325_v52 }
  0xb4   : > { %v291_v55 = vpop.permute.xlu1 %290 }
  0xb5   : > { %v331_v56 = vmax.f32 %v323_v51, %v327_v53  ;;  %v333_v57 = vmax.f32 %v325_v52, %v329_v54  ;;  %v297_v59 = vmul.f32 %v293_v37, %v291_v55  ;;  %v316_v60 = vpop.permute.xlu0 %315 }
  0xb6   : > { %v322_v63 = vmul.f32 %v318_v33, %v316_v60 }
  0xb7   : > { %335 = vst [vmem:[%s185_s29] sm:$0xff] %v331_v56  ;;  %v301_v0 = vadd.f32 %v297_v59, %v276_v58 }
  0xb8   : > { %337 = vst [vmem:[%s185_s29 + $0x10] sm:$0xff] %v333_v57 }
  0xb9   : > { %v326_v2 = vadd.f32 %v322_v63, %v301_v0 }
  0xbb   : > { %v330_v5 = vmul.f32 0.1, %v326_v2 }
  0xbd   : > { %v334_v6 = vmax.f32 %v326_v2, %v330_v5  ;;  %v308_v7 = vpop.permute.xlu1 %307 }
  0xbe   : > { %v320_v9 = vmul.f32 %v318_v33, %v308_v7 }
  0xbf   : > { %338 = vst [vmem:[%s185_s29 + $0x18] sm:$0xff] %v334_v6 }
  0xc0   : > { %v324_v10 = vadd.f32 %v320_v9, %v299_v8 }
  0xc2   : > { %v328_v11 = vmul.f32 0.1, %v324_v10 }
  0xc4   : > { %v332_v12 = vmax.f32 %v324_v10, %v328_v11 }
  0xc6   : > { %336 = vst [vmem:[%s185_s29 + $0x8] sm:$0xff] %v332_v12 }
  0xc7   : > { %567 = shalt.err (!%p564_p7)
}
  0xc8   : > { %s640_s24 = smov 128   ;;  %s641_s29 = smov 256  }
  0xc9   : > { %s642_s5 = smov 8  }
  0xca   : > { %450 = dma.vmem_to_hbm [thread:$0]  (%p714_p3), %s354_s8, 512, %s356_s15, %s340_s9, %s640_s24, %s641_s29, %s642_s5  }
  0xcb PF: > { %p456_p9 = scmp.ge.s32.totalorder %s634_s19, 2  ;;  %s370_s16 = sand.u32 1, %s606_s12  }
  0xcc   : > { %s371_s6 = scalar_lea.sflag [#allocation3], %s370_s16 }
  0xcd   : > { %p453_p10 = pnand %p456_p9, %p723_p8 }
  0xcf   : > { %p454_p11 = pneg %p453_p10 }
  0xd1   : > { %601 = dma.done.wait (%p454_p11), %s371_s6, 512  }
  0xd2   : > { %603 = vsyncadd (%p454_p11), %s371_s6, 4294966784  ;;  %s16_s19 = sadd.s32 1, %s634_s19   ;;  %s819_s12 = smov %s610_s13 }
  0xd3   : > { %p13_p12 = scmp.ge.s32.totalorder %s16_s19, 6   ;;  %s820_s13 = smov %s614_s14 }
  0xd4   : > { %s821_s14 = smov %s732_s30  ;;  %s822_s15 = smov %s626_s17 }
  0xd5   : > { %s823_s16 = smov %s630_s18  ;;  %s824_s17 = smov %s827_s22 }
  0xd6   : > { %s825_s18 = smov %s831_s23  ;;  %15 = sbr.rel (!%p13_p12) target bundleno = 5 (0x5), region = 67 }
  0xdb   :  { %377 = vsyncpa [#allocation3], 1 }
  0xdc   :  { %379 = vsyncpa [#allocation3 + $0x1], 1 }

</bundles_post_ra>
